<compile_context>
chip_gen: v5e
topology: v5e:2x2
jax: 0.10.0
libtpu: 0.0.40
codegen_flags: <defaults>
</compile_context>

<pallas_src>
import jax
import jax.numpy as jnp
from jax.experimental import pallas as pl
from jax.experimental.pallas import tpu as pltpu


def _round_up(x, m):
    return (x + m - 1) // m * m


# -----------------------------------------------------------------------------
# Pallas kernel: fused 3-layer MLP (Linear+ReLU, Linear+ReLU, Linear)
#   x_ref  : (TM, state_dim)           f32 or bf16
#   w*_ref : (in_dim, out_dim)         bf16  (resident in VMEM, constant index)
#   b*_ref : (1, out_dim)              f32
#   out_ref: (TM, action_dim*num_quantiles) f32   (128 lanes -> lane-dense)
# -----------------------------------------------------------------------------
def qrdqn_kernel(x_ref, w1_ref, w2_ref, w3_ref, b1_ref, b2_ref, b3_ref, out_ref):
    x = x_ref[...]
    if x.dtype != jnp.bfloat16:
        x = x.astype(jnp.bfloat16)

    # Hidden layer 1: ReLU(x @ W1 + b1)   (bf16 MXU operands, f32 accumulation)
    h = jnp.dot(x, w1_ref[...], preferred_element_type=jnp.float32) + b1_ref[...]
    h = jnp.maximum(h, 0.0).astype(jnp.bfloat16)
    # TODO(synk): nn.Dropout(0.3) is stochastic in train mode; eval-mode identity here.

    # Hidden layer 2: ReLU(h @ W2 + b2)
    h = jnp.dot(h, w2_ref[...], preferred_element_type=jnp.float32) + b2_ref[...]
    h = jnp.maximum(h, 0.0).astype(jnp.bfloat16)

    # Quantile head: h @ W3 + b3  -> (TM, action_dim * num_quantiles)
    q = jnp.dot(h, w3_ref[...], preferred_element_type=jnp.float32) + b3_ref[...]
    out_ref[...] = q.astype(out_ref.dtype)


def _choose_batch_tiling(B):
    """Returns (TM, n_steps).  TM is a multiple of 16 (bf16 sublane tile)."""
    B16 = _round_up(max(B, 1), 16)
    if B16 <= 256:
        # Tiny-batch RL inference path: irreducibly latency-bound, single step.
        return B16, 1
    # Large batch: cap TM at 1024 rows (fits comfortably in VMEM on all chips,
    # incl. v7x's 64 MiB), use >=2 steps and an even step count so v7x's two
    # TensorCores each get the same number of "parallel" grid steps.
    n = max(pl.cdiv(B16, 1024), 2)
    if n % 2:
        n += 1
    tm = _round_up(pl.cdiv(B16, n), 16)   # ceil split -> padding waste < 16*n rows
    return tm, n


def qrdqn_forward(state, kernel_params, action_dim, num_quantiles):
    """Runs the fused MLP kernel and reshapes to (-1, action_dim, num_quantiles)."""
    if state.ndim == 1:
        state = state[None, :]            # matches torch's unsqueeze(0)
    w1, w2, w3, b1, b2, b3 = kernel_params
    state_dim = w1.shape[0]
    out_dim = w3.shape[1]
    B = state.shape[0]

    TM, n_steps = _choose_batch_tiling(B)
    B_pad = TM * n_steps

    x = state                              # keep caller dtype (f32 or bf16)
    if B_pad != B:
        x = jnp.pad(x, ((0, B_pad - B), (0, 0)))

    full = lambda a: pl.BlockSpec(a.shape, lambda i: (0, 0))   # resident, DMA'd once

    quantiles_flat = pl.pallas_call(
        qrdqn_kernel,
        out_shape=jax.ShapeDtypeStruct((B_pad, out_dim), jnp.float32),
        grid=(n_steps,),
        in_specs=[
            pl.BlockSpec((TM, state_dim), lambda i: (i, 0)),
            full(w1), full(w2), full(w3),
            full(b1), full(b2), full(b3),
        ],
        out_specs=pl.BlockSpec((TM, out_dim), lambda i: (i, 0)),
        compiler_params=pltpu.CompilerParams(
            dimension_semantics=("parallel",),
            vmem_limit_bytes=32 << 20,
        ),
    )(x, w1, w2, w3, b1, b2, b3)

    if B_pad != B:
        quantiles_flat = quantiles_flat[:B]
    return quantiles_flat.reshape(-1, action_dim, num_quantiles)


# -----------------------------------------------------------------------------
# Deterministic parameter init: orthogonal_(gain=sqrt(2)) weights, zero biases
# -----------------------------------------------------------------------------
def orthogonal_init(key, out_dim, in_dim, gain):
    """Mimics torch.nn.init.orthogonal_ for a (out_dim, in_dim) weight."""
    rows, cols = out_dim, in_dim
    flat = jax.random.normal(key, (max(rows, cols), min(rows, cols)), jnp.float32)
    q, r = jnp.linalg.qr(flat)
    q = q * jnp.sign(jnp.diag(r))[None, :]     # sign fix, as in torch's impl
    if rows < cols:
        q = q.T
    return gain * q[:rows, :cols]


def make_params(key, state_dim, hidden_dims, action_dim, num_quantiles):
    """Returns (w1, b1, w2, b2, w3, b3): weights (in,out) f32, biases (1,out) f32."""
    gain = jnp.sqrt(2.0)
    dims = [state_dim] + list(hidden_dims) + [action_dim * num_quantiles]
    params = []
    for i in range(len(dims) - 1):
        key, sub = jax.random.split(key)
        in_d, out_d = dims[i], dims[i + 1]
        w_torch = orthogonal_init(sub, out_d, in_d, gain)   # (out, in) as in PyTorch
        params.extend([jnp.asarray(w_torch.T),              # kernel layout (in, out)
                       jnp.zeros((1, out_d), jnp.float32)])
    return tuple(params)


def prepare_kernel_params(params):
    """Casts weights to bf16 (kernel/MXU layout); hoist this outside inference."""
    w1, b1, w2, b2, w3, b3 = params
    return (w1.astype(jnp.bfloat16), w2.astype(jnp.bfloat16), w3.astype(jnp.bfloat16),
            b1, b2, b3)


# -----------------------------------------------------------------------------
# Pure-JAX reference (same bf16-weight / f32-accumulation precision as kernel)
# -----------------------------------------------------------------------------
def reference_forward(state, params, action_dim, num_quantiles):
    if state.ndim == 1:
        state = state[None, :]
    w1, b1, w2, b2, w3, b3 = params

    def lin(x, w, b):
        return jnp.dot(x.astype(jnp.bfloat16), w.astype(jnp.bfloat16),
                       preferred_element_type=jnp.float32) + b

    h = jnp.maximum(lin(state, w1, b1), 0.0)
    h = jnp.maximum(lin(h, w2, b2), 0.0)
    q = lin(h, w3, b3)
    return q.reshape(-1, action_dim, num_quantiles)


if __name__ == "__main__":
    # Small shapes consistent with the module (hidden_dims uses the module default).
    batch = 8
    state_dim = 32
    hidden_dims = [256, 256]
    action_dim = 4
    num_quantiles = 32

    key = jax.random.PRNGKey(0)
    key_p, key_x = jax.random.split(key)
    params = make_params(key_p, state_dim, hidden_dims, action_dim, num_quantiles)
    kparams = prepare_kernel_params(params)       # hoisted: bf16 weight cast done once
    state = jax.random.normal(key_x, (batch, state_dim), jnp.float32)

    out = qrdqn_forward(state, kparams, action_dim, num_quantiles)
    out = jax.block_until_ready(out)

    ref = reference_forward(state, params, action_dim, num_quantiles)
    assert out.shape == (batch, action_dim, num_quantiles), out.shape
    assert jnp.allclose(out, ref, atol=1e-2, rtol=1e-2), "mismatch vs reference"

    print("KERNEL_OK")
</pallas_src>

<mosaic_0001>
module attributes {stable_mosaic.version = 11 : i64} {
  func.func @qrdqn_kernel(%arg0: i32, %arg1: memref<16x32xf32, #tpu.memory_space<vmem>>, %arg2: memref<32x256xbf16, #tpu.memory_space<vmem>>, %arg3: memref<256x256xbf16, #tpu.memory_space<vmem>>, %arg4: memref<256x128xbf16, #tpu.memory_space<vmem>>, %arg5: memref<1x256xf32, #tpu.memory_space<vmem>>, %arg6: memref<1x256xf32, #tpu.memory_space<vmem>>, %arg7: memref<1x128xf32, #tpu.memory_space<vmem>>, %arg8: memref<16x128xf32, #tpu.memory_space<vmem>>) attributes {dimension_semantics = [#tpu.dimension_semantics<parallel>], iteration_bounds = array<i64: 1>, scalar_prefetch = 0 : i64, scratch_operands = 0 : i64, tpu.core_type = #tpu.core_type<tc>, window_params = [{transform_indices = @transform_0, window_bounds = array<i64: 16, 32>}, {pipeline_mode = #tpu.pipeline_mode<synchronous>, transform_indices = @transform_1, window_bounds = array<i64: 32, 256>}, {pipeline_mode = #tpu.pipeline_mode<synchronous>, transform_indices = @transform_2, window_bounds = array<i64: 256, 256>}, {pipeline_mode = #tpu.pipeline_mode<synchronous>, transform_indices = @transform_3, window_bounds = array<i64: 256, 128>}, {pipeline_mode = #tpu.pipeline_mode<synchronous>, transform_indices = @transform_4, window_bounds = array<i64: 1, 256>}, {pipeline_mode = #tpu.pipeline_mode<synchronous>, transform_indices = @transform_5, window_bounds = array<i64: 1, 256>}, {pipeline_mode = #tpu.pipeline_mode<synchronous>, transform_indices = @transform_6, window_bounds = array<i64: 1, 128>}, {transform_indices = @transform_7, window_bounds = array<i64: 16, 128>}]} {
    %c0 = arith.constant 0 : index
    %c0_0 = arith.constant 0 : index
    %0 = vector.load %arg1[%c0, %c0_0] : memref<16x32xf32, #tpu.memory_space<vmem>>, vector<16x32xf32>
    %1 = arith.truncf %0 : vector<16x32xf32> to vector<16x32xbf16>
    %c0_1 = arith.constant 0 : index
    %c0_2 = arith.constant 0 : index
    %2 = vector.load %arg2[%c0_1, %c0_2] : memref<32x256xbf16, #tpu.memory_space<vmem>>, vector<32x256xbf16>
    %cst = arith.constant dense<0.000000e+00> : vector<16x256xf32>
    %3 = tpu.matmul %1, %2, %cst {dimension_numbers = #tpu.dot_dimension_numbers<[1], [0], [0], [1], [0, 0, 1, 1], [], []>} : vector<16x32xbf16>, vector<32x256xbf16>, vector<16x256xf32> -> vector<16x256xf32>
    %c0_3 = arith.constant 0 : index
    %c0_4 = arith.constant 0 : index
    %4 = vector.load %arg5[%c0_3, %c0_4] : memref<1x256xf32, #tpu.memory_space<vmem>>, vector<1x256xf32>
    %5 = vector.broadcast %4 : vector<1x256xf32> to vector<16x256xf32>
    %6 = arith.addf %3, %5 : vector<16x256xf32>
    %cst_5 = arith.constant 0.000000e+00 : f32
    %7 = vector.broadcast %cst_5 : f32 to vector<16x256xf32>
    %8 = arith.maximumf %6, %7 : vector<16x256xf32>
    %9 = arith.truncf %8 : vector<16x256xf32> to vector<16x256xbf16>
    %c0_6 = arith.constant 0 : index
    %c0_7 = arith.constant 0 : index
    %10 = vector.load %arg3[%c0_6, %c0_7] : memref<256x256xbf16, #tpu.memory_space<vmem>>, vector<256x256xbf16>
    %cst_8 = arith.constant dense<0.000000e+00> : vector<16x256xf32>
    %11 = tpu.matmul %9, %10, %cst_8 {dimension_numbers = #tpu.dot_dimension_numbers<[1], [0], [0], [1], [0, 0, 1, 1], [], []>} : vector<16x256xbf16>, vector<256x256xbf16>, vector<16x256xf32> -> vector<16x256xf32>
    %c0_9 = arith.constant 0 : index
    %c0_10 = arith.constant 0 : index
    %12 = vector.load %arg6[%c0_9, %c0_10] : memref<1x256xf32, #tpu.memory_space<vmem>>, vector<1x256xf32>
    %13 = vector.broadcast %12 : vector<1x256xf32> to vector<16x256xf32>
    %14 = arith.addf %11, %13 : vector<16x256xf32>
    %cst_11 = arith.constant 0.000000e+00 : f32
    %15 = vector.broadcast %cst_11 : f32 to vector<16x256xf32>
    %16 = arith.maximumf %14, %15 : vector<16x256xf32>
    %17 = arith.truncf %16 : vector<16x256xf32> to vector<16x256xbf16>
    %c0_12 = arith.constant 0 : index
    %c0_13 = arith.constant 0 : index
    %18 = vector.load %arg4[%c0_12, %c0_13] : memref<256x128xbf16, #tpu.memory_space<vmem>>, vector<256x128xbf16>
    %cst_14 = arith.constant dense<0.000000e+00> : vector<16x128xf32>
    %19 = tpu.matmul %17, %18, %cst_14 {dimension_numbers = #tpu.dot_dimension_numbers<[1], [0], [0], [1], [0, 0, 1, 1], [], []>} : vector<16x256xbf16>, vector<256x128xbf16>, vector<16x128xf32> -> vector<16x128xf32>
    %c0_15 = arith.constant 0 : index
    %c0_16 = arith.constant 0 : index
    %20 = vector.load %arg7[%c0_15, %c0_16] : memref<1x128xf32, #tpu.memory_space<vmem>>, vector<1x128xf32>
    %21 = vector.broadcast %20 : vector<1x128xf32> to vector<16x128xf32>
    %22 = arith.addf %19, %21 : vector<16x128xf32>
    %c0_17 = arith.constant 0 : index
    %c0_18 = arith.constant 0 : index
    %23 = vector.load %arg8[%c0_17, %c0_18] : memref<16x128xf32, #tpu.memory_space<vmem>>, vector<16x128xf32>
    tpu.vector_store %arg8[%c0_17, %c0_18], %22 {strides = array<i32>} : memref<16x128xf32, #tpu.memory_space<vmem>>, vector<16x128xf32>,
    return
  }
  func.func @transform_0(%arg0: i32) -> (i32, i32) {
    %c0_i32 = arith.constant 0 : i32
    %c0_i32_0 = arith.constant 0 : i32
    return %arg0, %c0_i32 : i32, i32
  }
  func.func @transform_1(%arg0: i32) -> (i32, i32) {
    %c0_i32 = arith.constant 0 : i32
    %c0_i32_0 = arith.constant 0 : i32
    %c0_i32_1 = arith.constant 0 : i32
    return %c0_i32, %c0_i32_0 : i32, i32
  }
  func.func @transform_2(%arg0: i32) -> (i32, i32) {
    %c0_i32 = arith.constant 0 : i32
    %c0_i32_0 = arith.constant 0 : i32
    %c0_i32_1 = arith.constant 0 : i32
    return %c0_i32, %c0_i32_0 : i32, i32
  }
  func.func @transform_3(%arg0: i32) -> (i32, i32) {
    %c0_i32 = arith.constant 0 : i32
    %c0_i32_0 = arith.constant 0 : i32
    %c0_i32_1 = arith.constant 0 : i32
    return %c0_i32, %c0_i32_0 : i32, i32
  }
  func.func @transform_4(%arg0: i32) -> (i32, i32) {
    %c0_i32 = arith.constant 0 : i32
    %c0_i32_0 = arith.constant 0 : i32
    %c0_i32_1 = arith.constant 0 : i32
    return %c0_i32, %c0_i32_0 : i32, i32
  }
  func.func @transform_5(%arg0: i32) -> (i32, i32) {
    %c0_i32 = arith.constant 0 : i32
    %c0_i32_0 = arith.constant 0 : i32
    %c0_i32_1 = arith.constant 0 : i32
    return %c0_i32, %c0_i32_0 : i32, i32
  }
  func.func @transform_6(%arg0: i32) -> (i32, i32) {
    %c0_i32 = arith.constant 0 : i32
    %c0_i32_0 = arith.constant 0 : i32
    %c0_i32_1 = arith.constant 0 : i32
    return %c0_i32, %c0_i32_0 : i32, i32
  }
  func.func @transform_7(%arg0: i32) -> (i32, i32) {
    %c0_i32 = arith.constant 0 : i32
    %c0_i32_0 = arith.constant 0 : i32
    return %arg0, %c0_i32 : i32, i32
  }
}

</mosaic_0001>

<bundles_post_ra>
// kernel: tpu_custom_call.1
= control target key start
LH: loop header
LB: loop body
LE: loop exit
PB: predicated region body
PF: predicated region fallthrough
CT: control target
= control target key end

     0   :  { %12 = vsyncpa [#allocation3], 0  ;;  %s1092_s0 = inlined_call_operand.hbm [shape: f32[16,32], index: 0, kind: input, shape index: {}]   ;;  %s1093_s1 = inlined_call_operand.hbm [shape: bf16[32,256], index: 1, kind: input, shape index: {}]   ;;  %s1094_s2 = inlined_call_operand.hbm [shape: bf16[256,256], index: 2, kind: input, shape index: {}]   ;;  %s1095_s3 = inlined_call_operand.hbm [shape: bf16[256,128], index: 3, kind: input, shape index: {}]   ;;  %s1096_s4 = inlined_call_operand.vmem [shape: f32[1,256], index: 4, kind: input, shape index: {}]   ;;  %s1097_s5 = inlined_call_operand.vmem [shape: f32[1,256], index: 5, kind: input, shape index: {}]   ;;  %s1098_s6 = inlined_call_operand.vmem [shape: f32[1,128], index: 6, kind: input, shape index: {}]   ;;  %s1099_s7 = inlined_call_operand.hbm [shape: f32[16,128], index: 7, kind: output, shape index: {}]  }
   0x1   :  { %13 = vsyncpa [#allocation6], 0 }
   0x2   :  { %14 = vsyncpa [#allocation9], 0 }
   0x3   :  { %15 = vsyncpa [#allocation4], 0  ;;  %s33_s26 = sshll.u32 %s1093_s1, 4  ;;  %s1005_s27 = smov [#allocation5]   ;;  %s34_s26 = int_to_ptr.hbm [resolvable:$true] %s33_s26 }
   0x4   :  { %s35_s28 = sshll.u32 %s1005_s27, 4  ;;  %s20_s8 = sshll.u32 %s1092_s0, 4  ;;  %s36_s28 = int_to_ptr.vmem [resolvable:$true] %s35_s28  ;;  %s21_s8 = int_to_ptr.hbm [resolvable:$true] %s20_s8 }
   0x5   :  { %s1006_s9 = smov 128   ;;  %s1007_s10 = smov 8  }
   0x6   :  { %41 = dma.hbm_to_vmem [thread:$0]  %s34_s26, 512, %s36_s28, [#allocation6], %s1006_s9, %s1006_s9, %s1007_s10  }
   0x7   :  { %s1008_s11 = smov [#allocation2]   ;;  %s46_s1 = sshll.u32 %s1094_s2, 4  ;;  %s47_s1 = int_to_ptr.hbm [resolvable:$true] %s46_s1 }
   0x8   :  { %s22_s12 = sshll.u32 %s1008_s11, 4  ;;  %s59_s16 = sshll.u32 %s1095_s3, 4  ;;  %s23_s12 = int_to_ptr.vmem [resolvable:$true] %s22_s12  ;;  %s60_s16 = int_to_ptr.hbm [resolvable:$true] %s59_s16 }
   0x9   :  { %28 = dma.hbm_to_vmem [thread:$0]  %s21_s8, 256, %s23_s12, [#allocation3], %s1006_s9, %s1006_s9, %s1007_s10  }
   0xa   :  { %s1009_s17 = smov [#allocation7]   ;;  %s1010_s19 = smov [#allocation8]  }
   0xb   :  { %s48_s18 = sshll.u32 %s1009_s17, 4  ;;  %s61_s2 = sshll.u32 %s1010_s19, 4  ;;  %s49_s18 = int_to_ptr.vmem [resolvable:$true] %s48_s18  ;;  %s62_s2 = int_to_ptr.vmem [resolvable:$true] %s61_s2 }
   0xc   :  { %54 = dma.hbm_to_vmem [thread:$0]  %s47_s1, 4096, %s49_s18, [#allocation6], %s1006_s9, %s1006_s9, %s1007_s10  }
   0xd   :  { %s1011_s20 = smov 64   ;;  %s1012_s21 = smov 4  }
   0xe   :  { %67 = dma.hbm_to_vmem [thread:$0]  %s60_s16, 2048, %s62_s2, [#allocation9], %s1011_s20, %s1011_s20, %s1012_s21  }
   0xf   :  { %997 = dma.done.wait [#allocation3], 256  }
  0x10   :  { %998 = vsyncadd [#allocation3], 4294967040 }
  0x11   :  { %999 = dma.done.wait [#allocation6], 4608  }
  0x12   :  { %1000 = vsyncadd [#allocation6], 4294962688 }
  0x13   :  { %1001 = dma.done.wait [#allocation9], 2048  }
  0x14   :  { %1002 = vsyncadd [#allocation9], 4294965248  ;;  %v615_v0 = vld [vmem:[#allocation5 + $0x10] sm:$0xf]  ;;  %v818_v1 = vld [vmem:[#allocation5 + $0x14] sm:$0xf0] }
  0x15   :  { %v817_v2 = vld [vmem:[#allocation5 + $0x14] sm:$0xf]  ;;  %v616_v3 = vor.u32 %v818_v1, %v615_v0  ;;  %v617_v4 = vld [vmem:[#allocation5 + $0x18] sm:$0xf0]  ;;  %v607_v5 = vld [vmem:[#allocation5] sm:$0xf] }
  0x16   :  { %v816_v6 = vld [vmem:[#allocation5 + $0x4] sm:$0xf0]  ;;  %v620_v7 = vor.u32 %v817_v2, %v617_v4  ;;  %v815_v8 = vld [vmem:[#allocation5 + $0x4] sm:$0xf]  ;;  %v609_v9 = vld [vmem:[#allocation5 + $0x8] sm:$0xf0] }
  0x17   :  { %v91_v10 = vld [vmem:[#allocation2] sm:$0xff]  ;;  %134 = vmatpush.bf16.msra.mxu0 %v616_v3  ;;  %v608_v11 = vor.u32 %v816_v6, %v607_v5  ;;  %v92_v12 = vld [vmem:[#allocation2 + $0x8] sm:$0xff]  ;;  %vm124_vm0 = vcmask 261120   ;;  %v612_v15 = vor.u32 %v815_v8, %v609_v9  ;;  %v673_v27 = vld [vmem:[#allocation7 + $0x60] sm:$0xf]  ;;  %s1013_s25 = smov [#allocation10]  }
  0x18   :  { %v681_v13 = vld [vmem:[#allocation7 + $0x70] sm:$0xf]  ;;  %v834_v14 = vld [vmem:[#allocation7 + $0x74] sm:$0xf0]  ;;  %148 = vmatpush.bf16.msra.mxu1 %v620_v7  ;;  %v833_v19 = vld [vmem:[#allocation7 + $0x74] sm:$0xf]  ;;  %v93_v24 = vpack.c.bf16 %v92_v12, %v91_v10 }
  0x19   :  { %v682_v16 = vor.u32 %v834_v14, %v681_v13  ;;  %v745_v17 = vld [vmem:[#allocation7 + $0xf0] sm:$0xf]  ;;  %v850_v18 = vld [vmem:[#allocation7 + $0xf4] sm:$0xf0]  ;;  %v683_v21 = vld [vmem:[#allocation7 + $0x78] sm:$0xf0] }
  0x1a   :  { %v746_v20 = vor.u32 %v850_v18, %v745_v17  ;;  %v849_v22 = vld [vmem:[#allocation7 + $0xf4] sm:$0xf]  ;;  %v747_v23 = vld [vmem:[#allocation7 + $0xf8] sm:$0xf0]  ;;  %v686_v25 = vor.u32 %v833_v19, %v683_v21  ;;  %v832_v28 = vld [vmem:[#allocation7 + $0x64] sm:$0xf0] }
  0x1b   :  { %360 = vmatpush.bf16.msra.mxu2 %v682_v16  ;;  %v750_v26 = vor.u32 %v849_v22, %v747_v23  ;;  %v737_v29 = vld [vmem:[#allocation7 + $0xe0] sm:$0xf]  ;;  %135 = vmatpush.bf16.msra.mxu0 %v608_v11  ;;  %v674_v30 = vor.u32 %v832_v28, %v673_v27  ;;  %v848_v31 = vld [vmem:[#allocation7 + $0xe4] sm:$0xf0]  ;;  %v831_v32 = vld [vmem:[#allocation7 + $0x64] sm:$0xf] }
  0x1c   :  { %374 = vmatpush.bf16.msra.mxu3 %v746_v20  ;;  %v675_v33 = vld [vmem:[#allocation7 + $0x68] sm:$0xf0]  ;;  %149 = vmatpush.bf16.msra.mxu1 %v612_v15  ;;  %v738_v34 = vor.u32 %v848_v31, %v737_v29  ;;  %v847_v36 = vld [vmem:[#allocation7 + $0xe4] sm:$0xf]  ;;  %v665_v38 = vld [vmem:[#allocation7 + $0x50] sm:$0xf] }
  0x1d   :  { %v678_v35 = vor.u32 %v831_v32, %v675_v33  ;;  %v739_v37 = vld [vmem:[#allocation7 + $0xe8] sm:$0xf0]  ;;  %v830_v40 = vld [vmem:[#allocation7 + $0x54] sm:$0xf0]  ;;  %v729_v41 = vld [vmem:[#allocation7 + $0xd0] sm:$0xf] }
  0x1e   :  { %v742_v39 = vor.u32 %v847_v36, %v739_v37  ;;  %v846_v42 = vld [vmem:[#allocation7 + $0xd4] sm:$0xf0]  ;;  %621 = vmatmul.msk.bf16.vlgmr.msra.gmra.mxu0 %vm124_vm0, %v93_v24  ;;  %v666_v43 = vor.u32 %v830_v40, %v665_v38  ;;  %v829_v44 = vld [vmem:[#allocation7 + $0x54] sm:$0xf]  ;;  %v667_v45 = vld [vmem:[#allocation7 + $0x58] sm:$0xf0] }
  0x1f   :  { %388 = vmatpush.bf16.msrb.mxu0 %v686_v25  ;;  %361 = vmatpush.bf16.msra.mxu2 %v674_v30  ;;  %v845_v46 = vld [vmem:[#allocation7 + $0xd4] sm:$0xf]  ;;  %v730_v47 = vor.u32 %v846_v42, %v729_v41  ;;  %v731_v48 = vld [vmem:[#allocation7 + $0xd8] sm:$0xf0]  ;;  %v657_v49 = vld [vmem:[#allocation7 + $0x40] sm:$0xf]  ;;  %v670_v51 = vor.u32 %v829_v44, %v667_v45 }
  0x20   :  { %402 = vmatpush.bf16.msrb.mxu1 %v750_v26  ;;  %375 = vmatpush.bf16.msra.mxu3 %v738_v34  ;;  %v828_v50 = vld [vmem:[#allocation7 + $0x44] sm:$0xf0]  ;;  %v721_v52 = vld [vmem:[#allocation7 + $0xc0] sm:$0xf]  ;;  %v734_v54 = vor.u32 %v845_v46, %v731_v48  ;;  %v827_v55 = vld [vmem:[#allocation7 + $0x44] sm:$0xf] }
  0x21   :  { %622 = vmatmul.msk.bf16.vlgmr.msra.gmra.mxu1 %vm124_vm0, %v93_v24  ;;  %v844_v53 = vld [vmem:[#allocation7 + $0xc4] sm:$0xf0]  ;;  %v659_v56 = vld [vmem:[#allocation7 + $0x48] sm:$0xf0]  ;;  %v658_v57 = vor.u32 %v828_v50, %v657_v49  ;;  %v843_v58 = vld [vmem:[#allocation7 + $0xc4] sm:$0xf] }
  0x22   :  { %v723_v59 = vld [vmem:[#allocation7 + $0xc8] sm:$0xf0]  ;;  %v722_v60 = vor.u32 %v844_v53, %v721_v52  ;;  %v662_v61 = vor.u32 %v827_v55, %v659_v56  ;;  %v649_v63 = vld [vmem:[#allocation7 + $0x30] sm:$0xf]  ;;  %v826_v0 = vld [vmem:[#allocation7 + $0x34] sm:$0xf0] }
  0x23   :  { %389 = vmatpush.bf16.msrb.mxu0 %v678_v35  ;;  %362 = vmatpush.bf16.msra.mxu2 %v666_v43  ;;  %v726_v62 = vor.u32 %v843_v58, %v723_v59  ;;  %v713_v1 = vld [vmem:[#allocation7 + $0xb0] sm:$0xf]  ;;  %v650_v2 = vor.u32 %v826_v0, %v649_v63  ;;  %v842_v3 = vld [vmem:[#allocation7 + $0xb4] sm:$0xf0]  ;;  %v825_v4 = vld [vmem:[#allocation7 + $0x34] sm:$0xf] }
  0x24   :  { %403 = vmatpush.bf16.msrb.mxu1 %v742_v39  ;;  %376 = vmatpush.bf16.msra.mxu3 %v730_v47  ;;  %v651_v5 = vld [vmem:[#allocation7 + $0x38] sm:$0xf0]  ;;  %v714_v6 = vor.u32 %v842_v3, %v713_v1  ;;  %v841_v8 = vld [vmem:[#allocation7 + $0xb4] sm:$0xf]  ;;  %v641_v11 = vld [vmem:[#allocation7 + $0x20] sm:$0xf] }
  0x25   :  { %v654_v7 = vor.u32 %v825_v4, %v651_v5  ;;  %v715_v9 = vld [vmem:[#allocation7 + $0xb8] sm:$0xf0]  ;;  %v824_v12 = vld [vmem:[#allocation7 + $0x24] sm:$0xf0]  ;;  %v705_v14 = vld [vmem:[#allocation7 + $0xa0] sm:$0xf] }
  0x26   :  { %v718_v10 = vor.u32 %v841_v8, %v715_v9  ;;  %v642_v13 = vor.u32 %v824_v12, %v641_v11  ;;  %v840_v15 = vld [vmem:[#allocation7 + $0xa4] sm:$0xf0]  ;;  %v823_v16 = vld [vmem:[#allocation7 + $0x24] sm:$0xf]  ;;  %v643_v18 = vld [vmem:[#allocation7 + $0x28] sm:$0xf0] }
  0x27   :  { %390 = vmatpush.bf16.msrb.mxu0 %v670_v51  ;;  %363 = vmatpush.bf16.msra.mxu2 %v658_v57  ;;  %v706_v17 = vor.u32 %v840_v15, %v705_v14  ;;  %v839_v19 = vld [vmem:[#allocation7 + $0xa4] sm:$0xf]  ;;  %v707_v20 = vld [vmem:[#allocation7 + $0xa8] sm:$0xf0]  ;;  %v646_v21 = vor.u32 %v823_v16, %v643_v18  ;;  %v633_v23 = vld [vmem:[#allocation7 + $0x10] sm:$0xf] }
  0x28   :  { %404 = vmatpush.bf16.msrb.mxu1 %v734_v54  ;;  %377 = vmatpush.bf16.msra.mxu3 %v722_v60  ;;  %v710_v22 = vor.u32 %v839_v19, %v707_v20  ;;  %v822_v24 = vld [vmem:[#allocation7 + $0x14] sm:$0xf0]  ;;  %v697_v25 = vld [vmem:[#allocation7 + $0x90] sm:$0xf]  ;;  %v821_v28 = vld [vmem:[#allocation7 + $0x14] sm:$0xf] }
  0x29   :  { %v634_v26 = vor.u32 %v822_v24, %v633_v23  ;;  %v838_v27 = vld [vmem:[#allocation7 + $0x94] sm:$0xf0]  ;;  %v635_v29 = vld [vmem:[#allocation7 + $0x18] sm:$0xf0]  ;;  %v837_v32 = vld [vmem:[#allocation7 + $0x94] sm:$0xf] }
  0x2a   :  { %v698_v30 = vor.u32 %v838_v27, %v697_v25  ;;  %v638_v31 = vor.u32 %v821_v28, %v635_v29  ;;  %v699_v33 = vld [vmem:[#allocation7 + $0x98] sm:$0xf0]  ;;  %v625_v35 = vld [vmem:[#allocation7] sm:$0xf]  ;;  %v820_v36 = vld [vmem:[#allocation7 + $0x4] sm:$0xf0] }
  0x2b   :  { %391 = vmatpush.bf16.msrb.mxu0 %v662_v61  ;;  %364 = vmatpush.bf16.msra.mxu2 %v650_v2  ;;  %v702_v34 = vor.u32 %v837_v32, %v699_v33  ;;  %v689_v37 = vld [vmem:[#allocation7 + $0x80] sm:$0xf]  ;;  %v626_v38 = vor.u32 %v820_v36, %v625_v35  ;;  %v836_v39 = vld [vmem:[#allocation7 + $0x84] sm:$0xf0]  ;;  %v819_v40 = vld [vmem:[#allocation7 + $0x4] sm:$0xf] }
  0x2c   :  { %405 = vmatpush.bf16.msrb.mxu1 %v726_v62  ;;  %378 = vmatpush.bf16.msra.mxu3 %v714_v6  ;;  %v627_v41 = vld [vmem:[#allocation7 + $0x8] sm:$0xf0]  ;;  %v690_v42 = vor.u32 %v836_v39, %v689_v37  ;;  %v835_v44 = vld [vmem:[#allocation7 + $0x84] sm:$0xf]  ;;  %v866_v47 = vld [vmem:[#allocation8 + $0x78] sm:$0xff]  ;;  %s588_s26 = sshll.u32 %s1013_s25, 4  ;;  %s589_s26 = int_to_ptr.vmem [resolvable:$true] %s588_s26 }
  0x2d   :  { %v630_v43 = vor.u32 %v819_v40, %v627_v41  ;;  %v691_v45 = vld [vmem:[#allocation7 + $0x88] sm:$0xf0]  ;;  %v858_v48 = vld [vmem:[#allocation8 + $0x38] sm:$0xff]  ;;  %v865_v49 = vld [vmem:[#allocation8 + $0x70] sm:$0xff]  ;;  %s590_s29 = sshll.u32 %s1099_s7, 4  ;;  %s591_s29 = int_to_ptr.hbm [resolvable:$true] %s590_s29 }
  0x2e   :  { %v694_v46 = vor.u32 %v835_v44, %v691_v45  ;;  %v857_v50 = vld [vmem:[#allocation8 + $0x30] sm:$0xff]  ;;  %v864_v51 = vld [vmem:[#allocation8 + $0x68] sm:$0xff]  ;;  %v863_v52 = vld [vmem:[#allocation8 + $0x60] sm:$0xff] }
  0x2f   :  { %392 = vmatpush.bf16.msrb.mxu0 %v654_v7  ;;  %365 = vmatpush.bf16.msra.mxu2 %v642_v13  ;;  %v98_v53 = vld [vmem:[%s1096_s4] sm:$0x3]  ;;  %v856_v6 = vld [vmem:[#allocation8 + $0x28] sm:$0xff]  ;;  %v862_v7 = vld [vmem:[#allocation8 + $0x58] sm:$0xff] }
  0x30   :  { %406 = vmatpush.bf16.msrb.mxu1 %v718_v10  ;;  %379 = vmatpush.bf16.msra.mxu3 %v706_v17  ;;  %v100_v56 = vperm.slane %v98_v53, 0  ;;  %v101_v57 = vperm.slane %v98_v53, 1  ;;  %v855_v8 = vld [vmem:[#allocation8 + $0x20] sm:$0xff]  ;;  %v861_v9 = vld [vmem:[#allocation8 + $0x50] sm:$0xff]  ;;  %v854_v10 = vld [vmem:[#allocation8 + $0x18] sm:$0xff] }
  0x31   :  { %v860_v11 = vld [vmem:[#allocation8 + $0x48] sm:$0xff]  ;;  %v853_v12 = vld [vmem:[#allocation8 + $0x10] sm:$0xff]  ;;  %v859_v13 = vld [vmem:[#allocation8 + $0x40] sm:$0xff] }
  0x32   :  { %v852_v14 = vld [vmem:[#allocation8 + $0x8] sm:$0xff]  ;;  %v851_v15 = vld [vmem:[#allocation8] sm:$0xff]  ;;  %v194_v16 = vld [vmem:[%s1097_s5] sm:$0x3] }
  0x33   :  { %393 = vmatpush.bf16.msrb.mxu0 %v646_v21  ;;  %366 = vmatpush.bf16.msra.mxu2 %v634_v26  ;;  %v197_v18 = vperm.slane %v194_v16, 1  ;;  %v876_v41 = vld [vmem:[%s1098_s6] ss:$0 sm:$0xff] }
  0x34   :  { %407 = vmatpush.bf16.msrb.mxu1 %v710_v22  ;;  %380 = vmatpush.bf16.msra.mxu3 %v698_v30  ;;  %v196_v22 = vperm.slane %v194_v16, 0 }
  0x37   :  { %394 = vmatpush.bf16.msrb.mxu0 %v638_v31  ;;  %367 = vmatpush.bf16.msra.mxu2 %v626_v38 }
  0x38   :  { %408 = vmatpush.bf16.msrb.mxu1 %v702_v34  ;;  %381 = vmatpush.bf16.msra.mxu3 %v690_v42 }
  0x3b   :  { %395 = vmatpush.bf16.msrb.mxu0 %v630_v43  ;;  %554 = vmatpush.bf16.msrb.mxu2 %v858_v48 }
  0x3c   :  { %409 = vmatpush.bf16.msrb.mxu1 %v694_v46  ;;  %568 = vmatpush.bf16.msrb.mxu3 %v866_v47 }
  0x3f   :  { %555 = vmatpush.bf16.msrb.mxu2 %v857_v50 }
  0x40   :  { %569 = vmatpush.bf16.msrb.mxu3 %v865_v49 }
  0x43   :  { %556 = vmatpush.bf16.msrb.mxu2 %v856_v6 }
  0x44   :  { %570 = vmatpush.bf16.msrb.mxu3 %v864_v51 }
  0x47   :  { %557 = vmatpush.bf16.msrb.mxu2 %v855_v8 }
  0x48   :  { %571 = vmatpush.bf16.msrb.mxu3 %v863_v52 }
  0x4b   :  { %558 = vmatpush.bf16.msrb.mxu2 %v854_v10 }
  0x4c   :  { %572 = vmatpush.bf16.msrb.mxu3 %v862_v7 }
  0x4f   :  { %559 = vmatpush.bf16.msrb.mxu2 %v853_v12 }
  0x50   :  { %573 = vmatpush.bf16.msrb.mxu3 %v861_v9 }
  0x53   :  { %560 = vmatpush.bf16.msrb.mxu2 %v852_v14 }
  0x54   :  { %574 = vmatpush.bf16.msrb.mxu3 %v860_v11 }
  0x57   :  { %561 = vmatpush.bf16.msrb.mxu2 %v851_v15 }
  0x58   :  { %575 = vmatpush.bf16.msrb.mxu3 %v859_v13 }
  0x9b   :  { %v137_v54 = vpop.f32.mrf.mxu0 }
  0x9c   :  { %v138_v58 = vadd.f32 %v137_v54, %v100_v56 }
  0x9e   :  { %v151_v55 = vpop.f32.mrf.mxu1  ;;  %v156_v0 = vmax.f32 %v138_v58, 0.0 }
  0x9f   :  { %v152_v59 = vadd.f32 %v151_v55, %v101_v57 }
  0xa1   :  { %v157_v2 = vmax.f32 %v152_v59, 0.0 }
  0xa3   :  { %v139_v60 = vpop.f32.mrf.mxu0 }
  0xa4   :  { %v140_v61 = vadd.f32 %v139_v60, %v100_v56 }
  0xa6   :  { %v153_v62 = vpop.f32.mrf.mxu1  ;;  %v158_v1 = vmax.f32 %v140_v61, 0.0 }
  0xa7   :  { %v154_v63 = vadd.f32 %v153_v62, %v101_v57 }
  0xa8   :  { %v160_v4 = vpack.c.bf16 %v158_v1, %v156_v0 }
  0xa9   :  { %v159_v3 = vmax.f32 %v154_v63, 0.0 }
  0xaa   :  { %368 = vmatmul.bf16.vlgmr.msra.gmra.mxu2 %v160_v4  ;;  %396 = vmatmul.bf16.vlgmr.msrb.gmra.mxu0 %v160_v4 }
  0xab   :  { %v161_v5 = vpack.c.bf16 %v159_v3, %v157_v2 }
  0xad   :  { %382 = vmatmul.bf16.vlgmr.msra.gmra.mxu3 %v161_v5  ;;  %410 = vmatmul.bf16.vlgmr.msrb.gmra.mxu1 %v161_v5 }
 0x127   :  { %v397_v17 = vpop.f32.mrf.mxu0 }
 0x128   :  { %v398_v20 = vadd.f32 %v397_v17, %v197_v18 }
 0x12a   :  { %v411_v19 = vpop.f32.mrf.mxu1 }
 0x12b   :  { %v412_v25 = vadd.f32 %v411_v19, %v398_v20 }
 0x12d   :  { %v369_v21 = vpop.f32.mrf.mxu2  ;;  %v417_v30 = vmax.f32 %v412_v25, 0.0 }
 0x12e   :  { %v370_v28 = vadd.f32 %v369_v21, %v196_v22 }
 0x12f   :  { %v399_v24 = vpop.f32.mrf.mxu0 }
 0x130   :  { %v383_v23 = vpop.f32.mrf.mxu3  ;;  %v400_v26 = vadd.f32 %v399_v24, %v197_v18 }
 0x131   :  { %v384_v33 = vadd.f32 %v383_v23, %v370_v28 }
 0x132   :  { %v413_v27 = vpop.f32.mrf.mxu1 }
 0x133   :  { %v414_v29 = vadd.f32 %v413_v27, %v400_v26  ;;  %v416_v38 = vmax.f32 %v384_v33, 0.0 }
 0x135   :  { %v419_v31 = vmax.f32 %v414_v29, 0.0  ;;  %v371_v32 = vpop.f32.mrf.mxu2 }
 0x136   :  { %v372_v35 = vadd.f32 %v371_v32, %v196_v22 }
 0x137   :  { %v421_v34 = vpack.c.bf16 %v419_v31, %v417_v30 }
 0x138   :  { %v385_v36 = vpop.f32.mrf.mxu3 }
 0x139   :  { %v386_v37 = vadd.f32 %v385_v36, %v372_v35  ;;  %576 = vmatmul.bf16.vlgmr.msrb.gmra.mxu3 %v421_v34 }
 0x13b   :  { %v418_v39 = vmax.f32 %v386_v37, 0.0 }
 0x13d   :  { %v420_v40 = vpack.c.bf16 %v418_v39, %v416_v38 }
 0x13f   :  { %562 = vmatmul.bf16.vlgmr.msrb.gmra.mxu2 %v420_v40 }
 0x1bc   :  { %v577_v42 = vpop.f32.mrf.mxu3 }
 0x1c2   :  { %v563_v43 = vpop.f32.mrf.mxu2 }
 0x1c3   :  { %v564_v44 = vadd.f32 %v876_v41, %v563_v43 }
 0x1c4   :  { %v579_v48 = vpop.f32.mrf.mxu3 }
 0x1c5   :  { %v578_v45 = vadd.f32 %v577_v42, %v564_v44 }
 0x1c7   :  { %582 = vst [vmem:[#allocation10] sm:$0xff] %v578_v45 }
 0x1ca   :  { %v565_v46 = vpop.f32.mrf.mxu2 }
 0x1cb   :  { %v566_v47 = vadd.f32 %v876_v41, %v565_v46 }
 0x1cd   :  { %v580_v49 = vadd.f32 %v579_v48, %v566_v47 }
 0x1cf   :  { %583 = vst [vmem:[#allocation10 + $0x8] sm:$0xff] %v580_v49 }
 0x1d0   :  { %596 = dma.vmem_to_hbm [thread:$0]  %s589_s26, 256, %s591_s29, [#allocation4], %s1006_s9, %s1006_s9, %s1007_s10  }
 0x1d1   :  { %1003 = dma.done.wait [#allocation4], 256  }
 0x1d2   :  { %1004 = vsyncadd [#allocation4], 4294967040 }
 0x1d3   :  { %601 = vsyncpa [#allocation3], 1 }
 0x1d4   :  { %602 = vsyncpa [#allocation6], 1 }
 0x1d5   :  { %603 = vsyncpa [#allocation9], 1 }
 0x1d6   :  { %604 = vsyncpa [#allocation4], 1 }

</bundles_post_ra>
